<compile_context>
chip_gen: v5e
topology: v5e:2x2
jax: 0.10.0
libtpu: 0.0.40
codegen_flags: <defaults>
</compile_context>

<pallas_src>
import jax
import jax.numpy as jnp
from jax.experimental import pallas as pl
from jax.experimental.pallas import tpu as pltpu

_MAX_DMA_CHUNKS = 4           # a few concurrent DMAs is plenty for a memcpy
_CHUNK_MIN_BYTES = 1 << 20    # don't bother chunking below ~1 MiB


def _make_copy_kernel(bounds):
    """Build a kernel issuing one HBM->HBM DMA per contiguous chunk of dim 0."""
    n = len(bounds) - 1

    def kernel(x_ref, o_ref, sems):
        copies = []
        # Start every DMA first so the engines run concurrently ...
        for i in range(n):
            lo = bounds[i]
            size = bounds[i + 1] - bounds[i]
            cp = pltpu.make_async_copy(
                x_ref.at[pl.ds(lo, size)],
                o_ref.at[pl.ds(lo, size)],
                sems.at[i],
            )
            cp.start()
            copies.append(cp)
        # ... then wait on all of them.
        for cp in copies:
            cp.wait()

    return kernel


def _chunk_bounds(x: jax.Array):
    """Static chunk boundaries along dim 0 (single chunk for small / 1-D inputs)."""
    lead = x.shape[0]
    nbytes = x.size * jnp.dtype(x.dtype).itemsize
    if x.ndim < 2 or lead < 2 or nbytes < _CHUNK_MIN_BYTES:
        n = 1
    else:
        n = min(_MAX_DMA_CHUNKS, lead)
    return tuple((i * lead) // n for i in range(n + 1))


def dummy_forward(x: jax.Array) -> jax.Array:
    """Identity forward pass (Dummy.forward) as a Pallas TPU kernel."""
    if x.size == 0:
        return x

    orig_shape = x.shape
    # 0-d arrays: give the DMA at least one axis (free metadata reshape).
    xk = x if x.ndim >= 1 else jnp.reshape(x, (1,))

    bounds = _chunk_bounds(xk)
    n_chunks = len(bounds) - 1
    itemsize = int(jnp.dtype(xk.dtype).itemsize)

    out = pl.pallas_call(
        _make_copy_kernel(bounds),
        out_shape=jax.ShapeDtypeStruct(xk.shape, xk.dtype),
        in_specs=[pl.BlockSpec(memory_space=pl.ANY)],
        out_specs=pl.BlockSpec(memory_space=pl.ANY),
        scratch_shapes=[pltpu.SemaphoreType.DMA((n_chunks,))],
        compiler_params=pltpu.CompilerParams(has_side_effects=True),
        cost_estimate=pl.CostEstimate(
            flops=0,
            transcendentals=0,
            bytes_accessed=2 * xk.size * itemsize,
        ),
    )(xk)

    if out.shape != orig_shape:
        out = jnp.reshape(out, orig_shape)
    return out


if __name__ == "__main__":
    key = jax.random.PRNGKey(0)

    # Primary test: NCHW input, batch=2, C=4, H=W=16 (single-DMA path).
    x = jax.random.normal(key, (2, 4, 16, 16), dtype=jnp.float32)
    y = dummy_forward(x)
    jax.block_until_ready(y)
    assert y.shape == x.shape, (y.shape, x.shape)
    assert y.dtype == x.dtype, (y.dtype, x.dtype)
    assert bool(jnp.array_equal(y, x)), "identity mismatch (f32)"

    # Ragged shape + narrow dtype: no padding / slicing needed anymore.
    x2 = jax.random.normal(jax.random.PRNGKey(1), (3, 5, 7), dtype=jnp.bfloat16)
    y2 = dummy_forward(x2)
    jax.block_until_ready(y2)
    assert y2.shape == x2.shape and y2.dtype == x2.dtype
    assert bool(jnp.array_equal(y2, x2)), "identity mismatch (bf16 ragged)"

    # ~4 MiB input: exercises the multi-DMA (chunked) path.
    x3 = jax.random.normal(jax.random.PRNGKey(2), (8, 512, 256), dtype=jnp.float32)
    y3 = dummy_forward(x3)
    jax.block_until_ready(y3)
    assert y3.shape == x3.shape and y3.dtype == x3.dtype
    assert bool(jnp.array_equal(y3, x3)), "identity mismatch (chunked path)"

    print("KERNEL_OK")
</pallas_src>

<mosaic_0001>
module attributes {stable_mosaic.version = 11 : i64} {
  func.func @kernel(%arg0: memref<2x4x16x16xf32, #tpu.memory_space<any>>, %arg1: memref<2x4x16x16xf32, #tpu.memory_space<any>>, %arg2: memref<1x!tpu.dma_semaphore, #tpu.memory_space<semaphore_mem>>) attributes {dimension_semantics = [], scalar_prefetch = 0 : i64, scratch_operands = 1 : i64, tpu.core_type = #tpu.core_type<tc>} {
    %c0_i32 = arith.constant 0 : i32
    %c0_i32_0 = arith.constant 0 : i32
    %c0_i32_1 = arith.constant 0 : i32
    %c0_i32_2 = arith.constant 0 : i32
    %c0_i32_3 = arith.constant 0 : i32
    %0 = tpu.memref_slice %arg0[%c0_i32_0, %c0_i32_1, %c0_i32_2, %c0_i32_3] : memref<2x4x16x16xf32, #tpu.memory_space<any>> -> memref<2x4x16x16xf32, #tpu.memory_space<any>>
    %c0_i32_4 = arith.constant 0 : i32
    %c0_i32_5 = arith.constant 0 : i32
    %c0_i32_6 = arith.constant 0 : i32
    %c0_i32_7 = arith.constant 0 : i32
    %1 = tpu.memref_slice %arg1[%c0_i32_4, %c0_i32_5, %c0_i32_6, %c0_i32_7] : memref<2x4x16x16xf32, #tpu.memory_space<any>> -> memref<2x4x16x16xf32, #tpu.memory_space<any>>
    %2 = tpu.memref_slice %arg2[%c0_i32] : memref<1x!tpu.dma_semaphore, #tpu.memory_space<semaphore_mem>> -> memref<1x!tpu.dma_semaphore, #tpu.memory_space<semaphore_mem>>
    %3 = tpu.memref_squeeze %2 : memref<1x!tpu.dma_semaphore, #tpu.memory_space<semaphore_mem>> -> memref<!tpu.dma_semaphore, #tpu.memory_space<semaphore_mem>>
    tpu.enqueue_dma source(%0 : memref<2x4x16x16xf32, #tpu.memory_space<any>>) target(%1 : memref<2x4x16x16xf32, #tpu.memory_space<any>>) target_semaphore(%3 : memref<!tpu.dma_semaphore, #tpu.memory_space<semaphore_mem>>)
    %c0_i32_8 = arith.constant 0 : i32
    %c0_i32_9 = arith.constant 0 : i32
    %c0_i32_10 = arith.constant 0 : i32
    %c0_i32_11 = arith.constant 0 : i32
    %c0_i32_12 = arith.constant 0 : i32
    %4 = tpu.memref_slice %arg0[%c0_i32_9, %c0_i32_10, %c0_i32_11, %c0_i32_12] : memref<2x4x16x16xf32, #tpu.memory_space<any>> -> memref<2x4x16x16xf32, #tpu.memory_space<any>>
    %c0_i32_13 = arith.constant 0 : i32
    %c0_i32_14 = arith.constant 0 : i32
    %c0_i32_15 = arith.constant 0 : i32
    %c0_i32_16 = arith.constant 0 : i32
    %5 = tpu.memref_slice %arg1[%c0_i32_13, %c0_i32_14, %c0_i32_15, %c0_i32_16] : memref<2x4x16x16xf32, #tpu.memory_space<any>> -> memref<2x4x16x16xf32, #tpu.memory_space<any>>
    %6 = tpu.memref_slice %arg2[%c0_i32_8] : memref<1x!tpu.dma_semaphore, #tpu.memory_space<semaphore_mem>> -> memref<1x!tpu.dma_semaphore, #tpu.memory_space<semaphore_mem>>
    %7 = tpu.memref_squeeze %6 : memref<1x!tpu.dma_semaphore, #tpu.memory_space<semaphore_mem>> -> memref<!tpu.dma_semaphore, #tpu.memory_space<semaphore_mem>>
    tpu.wait_dma2 semaphore(%7 : memref<!tpu.dma_semaphore, #tpu.memory_space<semaphore_mem>>) src(%4 : memref<2x4x16x16xf32, #tpu.memory_space<any>>) dst(%5 : memref<2x4x16x16xf32, #tpu.memory_space<any>>)
    return
  }
}

</mosaic_0001>

<bundles_post_ra>
// kernel: tpu_custom_call.1
= control target key start
LH: loop header
LB: loop body
LE: loop exit
PB: predicated region body
PF: predicated region fallthrough
CT: control target
= control target key end

     0   :  { %s34_s12 = smov [#allocation2]   ;;  %s35_s13 = smov [#allocation3]   ;;  %s53_s0 = inlined_call_operand.hbm [shape: f32[2,4,16,16], index: 0, kind: input, shape index: {}]   ;;  %s54_s1 = inlined_call_operand.hbm [shape: f32[2,4,16,16], index: 1, kind: output, shape index: {}]  }
   0x1   :  { %s10_s8 = sshll.u32 %s53_s0, 4  ;;  %s12_s11 = sshll.u32 %s54_s1, 4  ;;  %s11_s8 = int_to_ptr.hbm [resolvable:$true] %s10_s8  ;;  %s13_s11 = int_to_ptr.hbm [resolvable:$true] %s12_s11 }
   0x2   :  { %s36_s14 = smov 0  }
   0x3   :  { %16 = dma.general %s11_s8, 2048, %s13_s11, %s34_s12, %s35_s13, [#allocation4], %s36_s14, 0  }
   0x4   :  { %32 = dma.done.wait [#allocation2], 2048 }
   0x5   :  { %33 = vsyncadd [#allocation2], 4294965248 }
   0x6   :  { %22 = vsyncmov [#allocation2] }
   0x9   :  { %s23_s15 = vpop.sfrf %22 }
   0xa   :  { %p28_p0 = scmp.ne.s32.totalorder %s23_s15, 0 }
   0xc   :  { %27 = shalt.err (%p28_p0)  }

</bundles_post_ra>
